<compile_context>
chip_gen: v6e
topology: v6e:2x2x1
jax: 0.10.0
libtpu: 0.0.40
codegen_flags: <defaults>
</compile_context>

<pallas_src>
import jax
import jax.numpy as jnp
from jax import lax
from jax.experimental import pallas as pl
from jax.experimental.pallas import tpu as pltpu

S_DIM = 1
A_DIM = 2
HIDDEN = 30
CHUNK = 128              # lanes processed per inner-loop step (one vreg width)
_SMALL_BATCH_TILE = 512  # below this padded batch size: single grid step
_MAX_TILE = 1024         # cap on the per-grid-step batch tile


def _round_up(n, m):
    return pl.cdiv(n, m) * m


def _tiling(batch):
    """Pick (padded_batch, batch_tile); both are multiples of CHUNK (=128)."""
    b128 = _round_up(batch, CHUNK)
    if b128 <= _SMALL_BATCH_TILE:
        tb = b128  # one grid step: avoid the ~0.35 us per-step fixed cost
    else:
        # >= 2 grid steps so "parallel" shards the batch across both v7x
        # TensorCores; cap the tile so it stays modest (VMEM is never binding).
        tb = min(_MAX_TILE, _round_up(pl.cdiv(b128, 2), CHUNK))
    return _round_up(b128, tb), tb


def actor_kernel(x_ref, w1b1_ref, w2b2_ref, out_ref):
    # x_ref    : (1, TB)            f32 — batch on the lane axis
    # w1b1_ref : (HIDDEN, 2)        f32 — [:, 0:1]=fc1.weight (out,in), [:, 1:2]=fc1.bias
    # w2b2_ref : (A_DIM, HIDDEN+1)  f32 — [:, :HIDDEN]=out.weight, [:, HIDDEN:]=out.bias
    # out_ref  : (A_DIM, TB)        f32
    w1b1 = w1b1_ref[...]
    w2b2 = w2b2_ref[...]
    w1 = w1b1[:, 0:1]                       # (HIDDEN, 1)
    b1 = w1b1[:, 1:2]                       # (HIDDEN, 1)
    w2 = w2b2[:, :HIDDEN]                   # (A_DIM, HIDDEN)
    b2 = w2b2[:, HIDDEN:HIDDEN + 1]         # (A_DIM, 1)
    n_chunks = x_ref.shape[-1] // CHUNK     # static (TB is a multiple of CHUNK)

    def body(c, carry):
        off = pl.multiple_of(c * CHUNK, CHUNK)
        x = x_ref[:, pl.ds(off, CHUNK)]                               # (1, CHUNK)
        # fc1 + relu.  K = S_DIM = 1, so x @ W1^T is an outer product: VPU
        # broadcast multiply; the (HIDDEN, CHUNK) intermediate lives in vregs.
        h = jnp.maximum(w1 * x + b1, 0.0)                             # (HIDDEN, CHUNK)
        # out layer on the MXU: N = CHUNK lanes is lane-dense.
        y = jnp.dot(w2, h, preferred_element_type=jnp.float32) + b2   # (A_DIM, CHUNK)
        # tanh(y / 5) * 2 with the divide folded into a constant multiply.
        out_ref[:, pl.ds(off, CHUNK)] = jnp.tanh(y * 0.2) * 2.0
        return carry

    lax.fori_loop(0, n_chunks, body, 0, unroll=True)


@jax.jit
def actor_forward(x, w1, b1, w2, b2):
    """x: (B, S_DIM) -> actions: (B, A_DIM).  Matches ActorNet.forward."""
    B = x.shape[0]
    B_pad, TB = _tiling(B)
    n_tiles = B_pad // TB

    # Batch on the lane (last) axis; zero-pad to a tile multiple.  Padded
    # columns compute benign values that are sliced off below.
    x_t = jnp.pad(x.astype(jnp.float32).T, ((0, 0), (0, B_pad - B)))

    # Pack parameters: 2 resident streams instead of 4 sub-KB ones.
    w1b1 = jnp.concatenate([w1, b1], axis=1)          # (HIDDEN, 2)
    w2b2 = jnp.concatenate([w2, b2], axis=1)          # (A_DIM, HIDDEN+1)

    def resident(shape):  # same block every grid step -> stays VMEM-resident
        return pl.BlockSpec(shape, lambda i: (0, 0))

    out_t = pl.pallas_call(
        actor_kernel,
        out_shape=jax.ShapeDtypeStruct((A_DIM, B_pad), jnp.float32),
        grid_spec=pltpu.PrefetchScalarGridSpec(
            num_scalar_prefetch=0,
            grid=(n_tiles,),
            in_specs=[
                pl.BlockSpec((S_DIM, TB), lambda i: (0, i)),   # x tile
                resident((HIDDEN, 2)),                          # w1 | b1
                resident((A_DIM, HIDDEN + 1)),                  # w2 | b2
            ],
            out_specs=pl.BlockSpec((A_DIM, TB), lambda i: (0, i)),
        ),
        compiler_params=pltpu.CompilerParams(
            dimension_semantics=("parallel",),
        ),
    )(x_t, w1b1, w2b2)

    # Slice off padding and return in the module's (B, A_DIM) layout; fused
    # with the kernel under this jit so there is no extra dispatch.
    return out_t[:, :B].T


def init_params(key):
    k1, k2, k3, k4 = jax.random.split(key, 4)
    # Weights: normal(0, 0.1), as in the PyTorch __init__, (out, in) layout.
    w1 = 0.1 * jax.random.normal(k1, (HIDDEN, S_DIM), dtype=jnp.float32)
    w2 = 0.1 * jax.random.normal(k2, (A_DIM, HIDDEN), dtype=jnp.float32)
    # Biases: PyTorch Linear default init U(-1/sqrt(fan_in), 1/sqrt(fan_in)),
    # stored as column vectors so they broadcast along the lane (batch) axis.
    bound1 = 1.0 / (S_DIM ** 0.5)
    bound2 = 1.0 / (HIDDEN ** 0.5)
    b1 = jax.random.uniform(k3, (HIDDEN, 1), jnp.float32, -bound1, bound1)
    b2 = jax.random.uniform(k4, (A_DIM, 1), jnp.float32, -bound2, bound2)
    return w1, b1, w2, b2


def reference_forward(x, w1, b1, w2, b2):
    h = jnp.maximum(x @ w1.T + b1.T, 0.0)
    y = h @ w2.T + b2.T
    return jnp.tanh(y / 5.0) * 2.0


if __name__ == "__main__":
    key = jax.random.PRNGKey(0)
    pkey, xkey1, xkey2 = jax.random.split(key, 3)
    w1, b1, w2, b2 = init_params(pkey)

    # Small batch: exercises padding (200 -> 256), single grid step, 2 chunks.
    x_small = jax.random.normal(xkey1, (200, S_DIM), dtype=jnp.float32)
    out_small = jax.block_until_ready(actor_forward(x_small, w1, b1, w2, b2))
    ref_small = reference_forward(x_small, w1, b1, w2, b2)
    assert out_small.shape == (200, A_DIM)
    assert jnp.allclose(out_small, ref_small, atol=1e-5, rtol=1e-5)

    # Larger batch: exercises the multi-tile (>=2 grid steps) path.
    x_big = jax.random.normal(xkey2, (1300, S_DIM), dtype=jnp.float32)
    out_big = jax.block_until_ready(actor_forward(x_big, w1, b1, w2, b2))
    ref_big = reference_forward(x_big, w1, b1, w2, b2)
    assert out_big.shape == (1300, A_DIM)
    assert jnp.allclose(out_big, ref_big, atol=1e-5, rtol=1e-5)

    print("KERNEL_OK")
</pallas_src>

<mosaic_0001>
module attributes {stable_mosaic.version = 11 : i64} {
  func.func @actor_kernel(%arg0: i32, %arg1: memref<1x256xf32, #tpu.memory_space<vmem>>, %arg2: memref<30x2xf32, #tpu.memory_space<vmem>>, %arg3: memref<2x31xf32, #tpu.memory_space<vmem>>, %arg4: memref<2x256xf32, #tpu.memory_space<vmem>>) attributes {dimension_semantics = [#tpu.dimension_semantics<parallel>], iteration_bounds = array<i64: 1>, scalar_prefetch = 0 : i64, scratch_operands = 0 : i64, tpu.core_type = #tpu.core_type<tc>, window_params = [{transform_indices = @transform_0, window_bounds = array<i64: 1, 256>}, {pipeline_mode = #tpu.pipeline_mode<synchronous>, transform_indices = @transform_1, window_bounds = array<i64: 30, 2>}, {pipeline_mode = #tpu.pipeline_mode<synchronous>, transform_indices = @transform_2, window_bounds = array<i64: 2, 31>}, {transform_indices = @transform_3, window_bounds = array<i64: 2, 256>}]} {
    %c0 = arith.constant 0 : index
    %c0_0 = arith.constant 0 : index
    %0 = vector.load %arg2[%c0, %c0_0] : memref<30x2xf32, #tpu.memory_space<vmem>>, vector<30x2xf32>
    %c0_1 = arith.constant 0 : index
    %c0_2 = arith.constant 0 : index
    %1 = vector.load %arg3[%c0_1, %c0_2] : memref<2x31xf32, #tpu.memory_space<vmem>>, vector<2x31xf32>
    %2 = vector.extract_strided_slice %0 {offsets = [0, 0], sizes = [30, 1], strides = [1, 1]} : vector<30x2xf32> to vector<30x1xf32>
    %3 = vector.extract_strided_slice %0 {offsets = [0, 1], sizes = [30, 1], strides = [1, 1]} : vector<30x2xf32> to vector<30x1xf32>
    %4 = vector.extract_strided_slice %1 {offsets = [0, 0], sizes = [2, 30], strides = [1, 1]} : vector<2x31xf32> to vector<2x30xf32>
    %5 = vector.extract_strided_slice %1 {offsets = [0, 30], sizes = [2, 1], strides = [1, 1]} : vector<2x31xf32> to vector<2x1xf32>
    %c0_i32 = arith.constant 0 : i32
    %c128_i32 = arith.constant 128 : i32
    %6 = arith.muli %c0_i32, %c128_i32 : i32
    %7 = tpu.assume_multiple %6, 128 : i32
    %c0_3 = arith.constant 0 : index
    %8 = arith.index_cast %7 : i32 to index
    %9 = vector.load %arg1[%c0_3, %8] : memref<1x256xf32, #tpu.memory_space<vmem>>, vector<1x128xf32>
    %10 = vector.broadcast %2 : vector<30x1xf32> to vector<30x128xf32>
    %11 = vector.broadcast %9 : vector<1x128xf32> to vector<30x128xf32>
    %12 = arith.mulf %10, %11 : vector<30x128xf32>
    %13 = vector.broadcast %3 : vector<30x1xf32> to vector<30x128xf32>
    %14 = arith.addf %12, %13 : vector<30x128xf32>
    %cst = arith.constant 0.000000e+00 : f32
    %15 = vector.broadcast %cst : f32 to vector<30x128xf32>
    %16 = arith.maximumf %14, %15 : vector<30x128xf32>
    %cst_4 = arith.constant dense<0.000000e+00> : vector<2x128xf32>
    %17 = tpu.matmul %4, %16, %cst_4 {dimension_numbers = #tpu.dot_dimension_numbers<[1], [0], [0], [1], [0, 0, 1, 1], [], []>} : vector<2x30xf32>, vector<30x128xf32>, vector<2x128xf32> -> vector<2x128xf32>
    %18 = vector.broadcast %5 : vector<2x1xf32> to vector<2x128xf32>
    %19 = arith.addf %17, %18 : vector<2x128xf32>
    %cst_5 = arith.constant 2.000000e-01 : f32
    %20 = vector.broadcast %cst_5 : f32 to vector<2x128xf32>
    %21 = arith.mulf %19, %20 : vector<2x128xf32>
    %22 = math.tanh %21 : vector<2x128xf32>
    %cst_6 = arith.constant 2.000000e+00 : f32
    %23 = vector.broadcast %cst_6 : f32 to vector<2x128xf32>
    %24 = arith.mulf %22, %23 : vector<2x128xf32>
    %c0_7 = arith.constant 0 : index
    %25 = arith.index_cast %7 : i32 to index
    %26 = vector.load %arg4[%c0_7, %25] : memref<2x256xf32, #tpu.memory_space<vmem>>, vector<2x128xf32>
    tpu.vector_store %arg4[%c0_7, %25], %24 {strides = array<i32>} : memref<2x256xf32, #tpu.memory_space<vmem>>, vector<2x128xf32>,
    %c1_i32 = arith.constant 1 : i32
    %c128_i32_8 = arith.constant 128 : i32
    %27 = arith.muli %c1_i32, %c128_i32_8 : i32
    %28 = tpu.assume_multiple %27, 128 : i32
    %c0_9 = arith.constant 0 : index
    %29 = arith.index_cast %28 : i32 to index
    %30 = vector.load %arg1[%c0_9, %29] : memref<1x256xf32, #tpu.memory_space<vmem>>, vector<1x128xf32>
    %31 = vector.broadcast %2 : vector<30x1xf32> to vector<30x128xf32>
    %32 = vector.broadcast %30 : vector<1x128xf32> to vector<30x128xf32>
    %33 = arith.mulf %31, %32 : vector<30x128xf32>
    %34 = vector.broadcast %3 : vector<30x1xf32> to vector<30x128xf32>
    %35 = arith.addf %33, %34 : vector<30x128xf32>
    %cst_10 = arith.constant 0.000000e+00 : f32
    %36 = vector.broadcast %cst_10 : f32 to vector<30x128xf32>
    %37 = arith.maximumf %35, %36 : vector<30x128xf32>
    %cst_11 = arith.constant dense<0.000000e+00> : vector<2x128xf32>
    %38 = tpu.matmul %4, %37, %cst_11 {dimension_numbers = #tpu.dot_dimension_numbers<[1], [0], [0], [1], [0, 0, 1, 1], [], []>} : vector<2x30xf32>, vector<30x128xf32>, vector<2x128xf32> -> vector<2x128xf32>
    %39 = vector.broadcast %5 : vector<2x1xf32> to vector<2x128xf32>
    %40 = arith.addf %38, %39 : vector<2x128xf32>
    %cst_12 = arith.constant 2.000000e-01 : f32
    %41 = vector.broadcast %cst_12 : f32 to vector<2x128xf32>
    %42 = arith.mulf %40, %41 : vector<2x128xf32>
    %43 = math.tanh %42 : vector<2x128xf32>
    %cst_13 = arith.constant 2.000000e+00 : f32
    %44 = vector.broadcast %cst_13 : f32 to vector<2x128xf32>
    %45 = arith.mulf %43, %44 : vector<2x128xf32>
    %c0_14 = arith.constant 0 : index
    %46 = arith.index_cast %28 : i32 to index
    %47 = vector.load %arg4[%c0_14, %46] : memref<2x256xf32, #tpu.memory_space<vmem>>, vector<2x128xf32>
    tpu.vector_store %arg4[%c0_14, %46], %45 {strides = array<i32>} : memref<2x256xf32, #tpu.memory_space<vmem>>, vector<2x128xf32>,
    %c2_i32 = arith.constant 2 : i32
    return
  }
  func.func @transform_0(%arg0: i32) -> (i32, i32) {
    %c0_i32 = arith.constant 0 : i32
    %c0_i32_0 = arith.constant 0 : i32
    return %c0_i32, %arg0 : i32, i32
  }
  func.func @transform_1(%arg0: i32) -> (i32, i32) {
    %c0_i32 = arith.constant 0 : i32
    %c0_i32_0 = arith.constant 0 : i32
    %c0_i32_1 = arith.constant 0 : i32
    return %c0_i32, %c0_i32_0 : i32, i32
  }
  func.func @transform_2(%arg0: i32) -> (i32, i32) {
    %c0_i32 = arith.constant 0 : i32
    %c0_i32_0 = arith.constant 0 : i32
    %c0_i32_1 = arith.constant 0 : i32
    return %c0_i32, %c0_i32_0 : i32, i32
  }
  func.func @transform_3(%arg0: i32) -> (i32, i32) {
    %c0_i32 = arith.constant 0 : i32
    %c0_i32_0 = arith.constant 0 : i32
    return %c0_i32, %arg0 : i32, i32
  }
}

</mosaic_0001>

<bundles_post_ra>
// kernel: actor_forward.1
= control target key start
LH: loop header
LB: loop body
LE: loop exit
PB: predicated region body
PF: predicated region fallthrough
CT: control target
= control target key end

     0   :  { %v318_v0 = vmov 1   ;;  %v319_v1 = vmov 0   ;;  %v320_v4 = vmov 0.0   ;;  %vm321_vm0 = vmmov 0   ;;  %s380_s1 = inlined_call_operand.vmem [shape: f32[30,2], index: 1, kind: input, shape index: {}]   ;;  %s381_s2 = inlined_call_operand.vmem [shape: f32[2,31], index: 2, kind: input, shape index: {}]   ;;  %s382_s0 = inlined_call_operand.vmem [shape: f32[1,256], index: 0, kind: input, shape index: {}]   ;;  %s383_s3 = inlined_call_operand.vmem [shape: f32[2,256], index: 3, kind: output, shape index: {}]  }
   0x1   :  { %308 = vset.pattern.permute.xlu1 %v318_v0  ;;  %307 = vset.pattern.permute.xlu0 %v319_v1  ;;  %v17_v2 = vld [vmem:[%s380_s1 + $0x18] sm:$0x3f]  ;;  %v16_v3 = vld [vmem:[%s380_s1 + $0x10] sm:$0xff]  ;;  %v15_v5 = vld [vmem:[%s380_s1 + $0x8] sm:$0xff]  ;;  %v322_v8 = vmov 30   ;;  %vm82_vm1 = vcmask 1045504  }
   0x2   :  { %63 = vperm.xlu1 %308, %v17_v2   ;;  %37 = vperm.xlu0 %307, %v17_v2   ;;  %v14_v6 = vld [vmem:[%s380_s1] sm:$0xff]  ;;  %vm79_vm2 = vcmask 244736  }
   0x3   :  { %280 = vmatprep.subr.mxu0 %v320_v4  ;;  %291 = vmatprep.subr.mxu1 %v320_v4  ;;  %v18_v7 = vld [vmem:[%s381_s2] sm:$0x3] }
   0x4   :  { %288 = vmatprep.mubr.msk.f32.mxu0 %vm321_vm0, %v320_v4  ;;  %299 = vmatprep.mubr.msk.f32.mxu1 %vm321_vm0, %v320_v4  ;;  %v262_v9 = vld [vmem:[%s382_s0] ss:$0 sm:$0xff]  ;;  %v266_v10 = vld [vmem:[%s382_s0 + $0x1] ss:$0 sm:$0xff] }
   0x6   :  { %309 = vset.pattern.permute.xlu1 %v319_v1  ;;  %32 = vperm.xlu0 %307, %v16_v3  }
   0x7   :  { %27 = vperm.xlu1 %309, %v15_v5  }
   0xa   :  { %310 = vset.pattern.permute.xlu0 %v318_v0 }
   0xb   :  { %59 = vperm.xlu0 %310, %v16_v3   ;;  %22 = vperm.xlu1 %309, %v14_v6  }
   0xf   :  { %51 = vperm.xlu0 %310, %v14_v6   ;;  %311 = vset.pattern.permute.xlu1 %v318_v0 }
  0x10   :  { %55 = vperm.xlu1 %311, %v15_v5  }
  0x13   :  { %313 = vset.pattern.permute.xlu0 %v322_v8 }
  0x14   :  { %312 = vset.pattern.permute.xlu1 %v322_v8 }
  0x15   :  { %76 = vperm.xlu1 %312, %v18_v7  }
  0x7d   :  { %v64_v11 = vpop.permute.xlu1 %63  ;;  %v38_v12 = vpop.permute.xlu0 %37 }
  0x7e   :  { %v49_v13 = vmul.f32 %v262_v9, %v38_v12  ;;  %v171_v14 = vmul.f32 %v266_v10, %v38_v12 }
  0x80   :  { %v69_v15 = vadd.f32 %v64_v11, %v49_v13  ;;  %v175_v16 = vadd.f32 %v171_v14, %v64_v11 }
  0x81   :  { %v33_v17 = vpop.permute.xlu0 %32 }
  0x82   :  { %v28_v18 = vpop.permute.xlu1 %27  ;;  %v73_v19 = vmax.f32 %v69_v15, 0.0  ;;  %v179_v20 = vmax.f32 %v175_v16, 0.0  ;;  %v48_v21 = vmul.f32 %v262_v9, %v33_v17  ;;  %v170_v22 = vmul.f32 %v266_v10, %v33_v17 }
  0x83   :  { %v47_v30 = vmul.f32 %v262_v9, %v28_v18  ;;  %v169_v31 = vmul.f32 %v266_v10, %v28_v18 }
  0x84   :  { %281 = vmatpush3.msk.msra.mxu0 %vm82_vm1, %v73_v19  ;;  %292 = vmatpush3.msk.msra.mxu1 %vm82_vm1, %v179_v20 }
  0x85   :  { %282 = vmatprep.subr.mxu0 %v320_v4  ;;  %293 = vmatprep.subr.mxu1 %v320_v4 }
  0x86   :  { %v60_v23 = vpop.permute.xlu0 %59  ;;  %v23_v24 = vpop.permute.xlu1 %22 }
  0x87   :  { %v68_v25 = vadd.f32 %v60_v23, %v48_v21  ;;  %v174_v26 = vadd.f32 %v170_v22, %v60_v23  ;;  %v46_v29 = vmul.f32 %v262_v9, %v23_v24  ;;  %v168_v32 = vmul.f32 %v266_v10, %v23_v24 }
  0x89   :  { %v72_v27 = vmax.f32 %v68_v25, 0.0  ;;  %v178_v28 = vmax.f32 %v174_v26, 0.0 }
  0x8a   :  { %v52_v33 = vpop.permute.xlu0 %51 }
  0x8b   :  { %v66_v34 = vadd.f32 %v52_v33, %v46_v29  ;;  %v56_v35 = vpop.permute.xlu1 %55  ;;  %283 = vmatpush3.msra.mxu0 %v72_v27  ;;  %294 = vmatpush3.msra.mxu1 %v178_v28  ;;  %v172_v36 = vadd.f32 %v168_v32, %v52_v33 }
  0x8c   :  { %v67_v37 = vadd.f32 %v56_v35, %v47_v30  ;;  %v173_v38 = vadd.f32 %v169_v31, %v56_v35  ;;  %284 = vmatprep.subr.mxu0 %v320_v4  ;;  %295 = vmatprep.subr.mxu1 %v320_v4 }
  0x8d   :  { %v70_v41 = vmax.f32 %v66_v34, 0.0  ;;  %v176_v42 = vmax.f32 %v172_v36, 0.0 }
  0x8e   :  { %v71_v39 = vmax.f32 %v67_v37, 0.0  ;;  %v177_v40 = vmax.f32 %v173_v38, 0.0 }
  0x90   :  { %285 = vmatpush3.msra.mxu0 %v71_v39  ;;  %296 = vmatpush3.msra.mxu1 %v177_v40  ;;  %v77_v43 = vpop.permute.xlu1 %76 }
  0x91   :  { %286 = vmatprep.subr.mxu0 %v320_v4  ;;  %297 = vmatprep.subr.mxu1 %v320_v4 }
  0x92   :  { %287 = vmatpush3.msra.mxu0 %v70_v41  ;;  %298 = vmatpush3.msra.mxu1 %v176_v42 }
  0x93   :  { %289 = vmatmul.mubr.msk.f32.vlgmr.msra.gmra.mxu0 %vm79_vm2, %v18_v7  ;;  %300 = vmatmul.mubr.msk.f32.vlgmr.msra.gmra.mxu1 %vm79_vm2, %v18_v7 }
 0x153   :  { %v152_v44 = vpop.f32.mrf.mxu0  ;;  %v249_v45 = vpop.f32.mrf.mxu1 }
 0x154   :  { %v153_v46 = vadd.f32 %v152_v44, %v77_v43  ;;  %v250_v47 = vadd.f32 %v249_v45, %v77_v43 }
 0x155   :  { %v290_v48 = vpop.f32.mrf.mxu0  ;;  %v301_v49 = vpop.f32.mrf.mxu1 }
 0x156   :  { %v156_v50 = vmul.f32 0.2, %v153_v46  ;;  %v253_v51 = vmul.f32 0.2, %v250_v47 }
 0x158   :  { %314 = vtanh.f32 %v156_v50 }
 0x159   :  { %316 = vtanh.f32 %v253_v51 }
 0x165   :  { %v315_v52 = vpop.eup %314 }
 0x166   :  { %v317_v53 = vpop.eup %316  ;;  %v158_v54 = vmul.f32 2.0, %v315_v52 }
 0x167   :  { %v255_v55 = vmul.f32 2.0, %v317_v53 }
 0x168   :  { %159 = vst [vmem:[%s383_s3] sm:$0x3] %v158_v54 }
 0x169   :  { %269 = vst [vmem:[%s383_s3 + $0x2] sm:$0x3] %v255_v55 }

</bundles_post_ra>
